<compile_context>
chip_gen: v6e
topology: v6e:2x2x1
jax: 0.10.0
libtpu: 0.0.40
codegen_flags: <defaults>
</compile_context>

<pallas_src>
import functools

import jax
import jax.numpy as jnp
from jax.experimental import pallas as pl
from jax.experimental.pallas import tpu as pltpu

EPS = 1e-5  # nn.LayerNorm default


# ---------------------------------------------------------------------------
# helpers
# ---------------------------------------------------------------------------
def _layernorm(x, gamma, beta):
    mu = jnp.mean(x, axis=-1, keepdims=True)
    var = jnp.mean((x - mu) ** 2, axis=-1, keepdims=True)
    return (x - mu) * jax.lax.rsqrt(var + EPS) * gamma + beta


def _erf(x):
    # Abramowitz & Stegun 7.1.26, |err| < 1.5e-7 (~f32 eps).
    # TODO(synk): lax.erf has no guaranteed Mosaic lowering, so exact (erf-based)
    # GELU is evaluated with this polynomial; matches torch.nn.GELU to ~1e-6.
    a1, a2, a3, a4, a5 = 0.254829592, -0.284496736, 1.421413741, -1.453152027, 1.061405429
    p = 0.3275911
    s = jnp.where(x >= 0.0, 1.0, -1.0)
    z = jnp.abs(x)
    t = 1.0 / (1.0 + p * z)
    poly = ((((a5 * t + a4) * t + a3) * t + a2) * t + a1) * t
    return s * (1.0 - poly * jnp.exp(-z * z))


def _gelu_exact(x):
    return 0.5 * x * (1.0 + _erf(x * 0.7071067811865476))


def _round_up(v, m):
    return ((v + m - 1) // m) * m


def _padded_bytes(shape, itemsize=4):
    """VMEM footprint of one block with (8,128) tiling of the last two dims."""
    dims = [int(d) for d in shape if d is not None]
    if not dims:
        return itemsize
    if len(dims) == 1:
        dims = [1] + dims
    lead = 1
    for d in dims[:-2]:
        lead *= d
    return lead * _round_up(dims[-2], 8) * _round_up(dims[-1], 128) * itemsize


def _vmem_limit(block_bytes):
    # double-buffered blocks + slack; stay within [32 MiB, 64 MiB] so the limit is
    # never below the scoped default yet safe on v7x's 64 MiB physical VMEM.
    need = 2 * block_bytes + 8 * 1024 * 1024
    return int(min(64 * 1024 * 1024, max(32 * 1024 * 1024, need)))


def _choose_tile(n, target=256):
    """Largest multiple of 16 (fallback 8) <= target that divides n, or n itself."""
    if n <= target:
        return n
    for step in (16, 8):
        t = (target // step) * step
        while t >= step:
            if n % t == 0:
                return t
            t -= step
    return n


# ---------------------------------------------------------------------------
# Kernel 1: norm1 + fused QKV projection (bf16 output)
# ---------------------------------------------------------------------------
def ln_qkv_kernel(x_ref, g_ref, b_ref, w_ref, qkv_ref):
    x = x_ref[...].astype(jnp.float32)                           # [TN, C]
    xn = _layernorm(x, g_ref[...], b_ref[...])                   # gamma/beta: [1, C]
    y = jnp.dot(xn.astype(jnp.bfloat16),
                w_ref[...].astype(jnp.bfloat16),
                preferred_element_type=jnp.float32)              # [TN, 3C]
    qkv_ref[...] = y.astype(qkv_ref.dtype)


def ln_qkv(x, gamma, beta, w_qkv, *, tile_n=256):
    B, N, C = x.shape
    C3 = w_qkv.shape[1]
    TN = _choose_tile(N, tile_n)
    grid = (B, N // TN)

    blk = (_padded_bytes((TN, C)) + 2 * _padded_bytes((1, C))
           + _padded_bytes((C, C3)) + _padded_bytes((TN, C3)))
    cost = pl.CostEstimate(
        flops=int(2 * B * N * C * C3 + 10 * B * N * C),
        transcendentals=int(B * N),
        bytes_accessed=int(4 * B * N * C + 2 * B * N * C3 + 4 * (C * C3 + 2 * C)))

    return pl.pallas_call(
        ln_qkv_kernel,
        out_shape=jax.ShapeDtypeStruct((B, N, C3), jnp.bfloat16),
        grid=grid,
        in_specs=[
            pl.BlockSpec((None, TN, C), lambda b, t: (b, t, 0)),
            pl.BlockSpec((1, C), lambda b, t: (0, 0)),
            pl.BlockSpec((1, C), lambda b, t: (0, 0)),
            pl.BlockSpec((C, C3), lambda b, t: (0, 0)),
        ],
        out_specs=pl.BlockSpec((None, TN, C3), lambda b, t: (b, t, 0)),
        compiler_params=pltpu.CompilerParams(
            dimension_semantics=("parallel", "parallel"),
            vmem_limit_bytes=_vmem_limit(blk)),
        cost_estimate=cost,
    )(x, gamma.reshape(1, C), beta.reshape(1, C), w_qkv)


# ---------------------------------------------------------------------------
# Kernel 2: fused pos-MLP + kNN vector attention + proj + residual
#           + norm2 + MLP(GELU) + residual
# ---------------------------------------------------------------------------
def attn_mlp_kernel(q_ref, kg_ref, vg_ref, rel_ref, res_ref,
                    dw1_ref, db1_ref, dw2_ref, db2_ref,
                    pw_ref, pb_ref, g2_ref, b2_ref,
                    mw1_ref, mb1_ref, mw2_ref, mb2_ref,
                    x_ref, attn_ref, *, num_heads):
    f32, bf16 = jnp.float32, jnp.bfloat16
    TN, C = q_ref.shape
    K = kg_ref.shape[1]
    H = num_heads
    d = C // H
    inv_sqrt_d = 1.0 / (float(d) ** 0.5)

    # ---- fc_delta positional MLP (fused): pos = ReLU(rel @ W1 + b1) @ W2 + b2 ----
    rel = rel_ref[...]                                           # [TN, K, 2] f32
    w1 = dw1_ref[...]                                            # [2, C]
    h1 = (rel[:, :, 0:1] * w1[0:1, :].reshape(1, 1, C)
          + rel[:, :, 1:2] * w1[1:2, :].reshape(1, 1, C)
          + db1_ref[...].reshape(1, 1, C))                       # [TN, K, C]
    h1 = jnp.maximum(h1, 0.0)
    pos = jnp.dot(h1.reshape(TN * K, C).astype(bf16),
                  dw2_ref[...].astype(bf16),
                  preferred_element_type=f32) + db2_ref[...]     # [TN*K, C]
    pos = pos.reshape(TN, K, C)

    # ---- vector attention: one full-width q*k pass + per-head segment matmuls ----
    q = q_ref[...].astype(f32)                                   # [TN, C]
    kg = kg_ref[...].astype(f32)                                 # [TN, K, C]
    prod = q[:, None, :] * kg                                    # [TN, K, C]

    c_ids = jax.lax.broadcasted_iota(jnp.int32, (C, H), 0) // d
    h_ids = jax.lax.broadcasted_iota(jnp.int32, (C, H), 1)
    seg_ch = jnp.where(c_ids == h_ids, 1.0, 0.0).astype(bf16)    # [C, H] head one-hot

    logits = jnp.dot(prod.reshape(TN * K, C).astype(bf16), seg_ch,
                     preferred_element_type=f32).reshape(TN, K, H) * inv_sqrt_d

    # softmax over K (per point, per head) — EUP exp / approx reciprocal
    m = jnp.max(logits, axis=1, keepdims=True)                   # [TN, 1, H]
    e = jnp.exp(logits - m)                                      # [TN, K, H]
    ssum = jnp.sum(e, axis=1, keepdims=True)                     # [TN, 1, H]
    a = e * pl.reciprocal(ssum, approx=True)                     # [TN, K, H]

    # broadcast attn weights back over each head's d channels (constant matmul)
    h_ids2 = jax.lax.broadcasted_iota(jnp.int32, (H, C), 0)
    c_ids2 = jax.lax.broadcasted_iota(jnp.int32, (H, C), 1) // d
    seg_hc = jnp.where(h_ids2 == c_ids2, 1.0, 0.0).astype(bf16)  # [H, C]
    a_b = jnp.dot(a.reshape(TN * K, H).astype(bf16), seg_hc,
                  preferred_element_type=f32).reshape(TN, K, C)  # [TN, K, C]

    vgp = vg_ref[...].astype(f32) + pos                          # v + pos_enc
    xa = jnp.sum(a_b * vgp, axis=1)                              # [TN, C]

    # projection (single C-wide dot) + residual 1 (drop_path = Identity)
    x1 = res_ref[...] + jnp.dot(xa.astype(bf16), pw_ref[...].astype(bf16),
                                preferred_element_type=f32) + pb_ref[...]

    # norm2 + MLP(GELU) + residual 2
    xn2 = _layernorm(x1, g2_ref[...], b2_ref[...])
    hdn = jnp.dot(xn2.astype(bf16), mw1_ref[...].astype(bf16),
                  preferred_element_type=f32) + mb1_ref[...]
    hdn = _gelu_exact(hdn)
    mlp = jnp.dot(hdn.astype(bf16), mw2_ref[...].astype(bf16),
                  preferred_element_type=f32) + mb2_ref[...]
    x_ref[...] = x1 + mlp

    # lane-dense attention-probability output: [TN, H*K], lane = h*K + k.
    # Built with K tiny constant placement matmuls (avoids a sublane->lane reshape).
    attn_flat = jnp.zeros((TN, H * K), f32)
    for k in range(K):
        row = jax.lax.broadcasted_iota(jnp.int32, (H, H * K), 0)
        col = jax.lax.broadcasted_iota(jnp.int32, (H, H * K), 1)
        place_k = jnp.where(col == row * K + k, 1.0, 0.0).astype(bf16)   # [H, H*K]
        attn_flat = attn_flat + jnp.dot(a[:, k, :].astype(bf16), place_k,
                                        preferred_element_type=f32)
    attn_ref[...] = attn_flat


def attn_mlp_block(q, k_g, v_g, rel, res, params, num_heads, *, tile_n=256):
    B, N, C = q.shape
    K = k_g.shape[2]
    H = num_heads
    Hd = params["mW1"].shape[1]
    TN = _choose_tile(N, tile_n)
    grid = (B, N // TN)
    kernel = functools.partial(attn_mlp_kernel, num_heads=num_heads)

    blk = (_padded_bytes((TN, C), 2) + _padded_bytes((TN, C))        # q (bf16), res
           + 2 * _padded_bytes((TN, K, C), 2)                        # k_g, v_g (bf16)
           + _padded_bytes((TN, K, 2))                               # rel
           + _padded_bytes((2, C)) + 2 * _padded_bytes((C, C))
           + _padded_bytes((C, Hd)) + _padded_bytes((Hd, C))
           + 6 * _padded_bytes((1, C)) + _padded_bytes((1, Hd))
           + _padded_bytes((TN, C))                                  # x out
           + _padded_bytes((TN, H * K))                              # attn out
           + 8 * _padded_bytes((TN, K, C)))                          # f32 temporaries

    flops = B * N * (4 * K * C + 2 * K * C * C + K * C + 2 * K * C * H
                     + 8 * K * H + 2 * K * H * C + 3 * K * C + 2 * C * C
                     + 12 * C + 2 * C * Hd + 10 * Hd + 2 * Hd * C
                     + 2 * K * H * H * K)
    cost = pl.CostEstimate(
        flops=int(flops),
        transcendentals=int(B * N * (K * H + Hd + H + 2)),
        bytes_accessed=int(B * N * (2 * C + 2 * 2 * K * C + 4 * (2 * C + 2 * K + H * K))
                           + 4 * (2 * C * C + 2 * C * Hd + 8 * C + 2 * Hd)))

    return pl.pallas_call(
        kernel,
        out_shape=(
            jax.ShapeDtypeStruct((B, N, C), jnp.float32),
            jax.ShapeDtypeStruct((B, N, H * K), jnp.float32),
        ),
        grid=grid,
        in_specs=[
            pl.BlockSpec((None, TN, C), lambda b, t: (b, t, 0)),          # q (bf16)
            pl.BlockSpec((None, TN, K, C), lambda b, t: (b, t, 0, 0)),    # k_g (bf16)
            pl.BlockSpec((None, TN, K, C), lambda b, t: (b, t, 0, 0)),    # v_g (bf16)
            pl.BlockSpec((None, TN, K, 2), lambda b, t: (b, t, 0, 0)),    # rel
            pl.BlockSpec((None, TN, C), lambda b, t: (b, t, 0)),          # residual
            pl.BlockSpec((2, C), lambda b, t: (0, 0)),                    # dW1
            pl.BlockSpec((1, C), lambda b, t: (0, 0)),                    # db1
            pl.BlockSpec((C, C), lambda b, t: (0, 0)),                    # dW2
            pl.BlockSpec((1, C), lambda b, t: (0, 0)),                    # db2
            pl.BlockSpec((C, C), lambda b, t: (0, 0)),                    # pW
            pl.BlockSpec((1, C), lambda b, t: (0, 0)),                    # pb
            pl.BlockSpec((1, C), lambda b, t: (0, 0)),                    # g2
            pl.BlockSpec((1, C), lambda b, t: (0, 0)),                    # b2
            pl.BlockSpec((C, Hd), lambda b, t: (0, 0)),                   # mW1
            pl.BlockSpec((1, Hd), lambda b, t: (0, 0)),                   # mb1
            pl.BlockSpec((Hd, C), lambda b, t: (0, 0)),                   # mW2
            pl.BlockSpec((1, C), lambda b, t: (0, 0)),                    # mb2
        ],
        out_specs=(
            pl.BlockSpec((None, TN, C), lambda b, t: (b, t, 0)),
            pl.BlockSpec((None, TN, H * K), lambda b, t: (b, t, 0)),
        ),
        compiler_params=pltpu.CompilerParams(
            dimension_semantics=("parallel", "parallel"),
            vmem_limit_bytes=_vmem_limit(blk)),
        cost_estimate=cost,
    )(q, k_g, v_g, rel, res,
      params["dW1"], params["db1"].reshape(1, C),
      params["dW2"], params["db2"].reshape(1, C),
      params["pW"], params["pb"].reshape(1, C),
      params["g2"].reshape(1, C), params["b2"].reshape(1, C),
      params["mW1"], params["mb1"].reshape(1, Hd),
      params["mW2"], params["mb2"].reshape(1, C))


# ---------------------------------------------------------------------------
# Block.forward (glue + Pallas kernels)
# ---------------------------------------------------------------------------
def block_forward(x, params, *, num_heads=4, model_k=8, out=False, tile_n=256):
    """x = (xyz, xy_embed, nns, xy_embed_list, _) — mirrors Block.forward."""
    xyz, xy_embed, nns, xy_embed_list, _ = x
    B, N, C = xy_embed.shape
    K = model_k
    knn_idx = nns[:, :, :K]                                   # [B, N, K]

    # kernel 1: norm1 + qkv (bf16 activations to halve downstream HBM traffic)
    qkv = ln_qkv(xy_embed, params["g1"], params["b1"], params["Wqkv"],
                 tile_n=tile_n)                               # [B, N, 3C] bf16
    q_feat, k_feat, v_feat = jnp.split(qkv, 3, axis=-1)

    # index_points gathers (torch.gather) — JAX glue.
    # TODO(synk): move the k/v gathers in-kernel (scalar-prefetched knn_idx + row
    # gather from a VMEM-resident per-batch [N, C] block) to avoid materializing
    # the [B,N,K,C] k_g / v_g tensors in HBM.
    gather = jax.vmap(lambda p, i: p[i])
    xy_knn = gather(xyz, knn_idx)                             # [B,N,K,2]
    k_g = gather(k_feat, knn_idx)                             # [B,N,K,C] bf16
    v_g = gather(v_feat, knn_idx)                             # [B,N,K,C] bf16
    rel = xyz[:, :, None, :] - xy_knn                         # [B,N,K,2] f32

    # kernel 2: fused pos-MLP + attention + proj + residual + norm2 + MLP + residual
    x_out, attn_flat = attn_mlp_block(q_feat, k_g, v_g, rel, xy_embed, params,
                                      num_heads, tile_n=tile_n)
    attn = attn_flat.reshape(B, N, num_heads, K).transpose(0, 2, 1, 3)  # [B,H,N,K]

    if out:
        xy_embed_list = xy_embed_list + [x_out]
    return (xyz, x_out, nns, xy_embed_list, [attn, knn_idx])


# ---------------------------------------------------------------------------
# Pure-JAX reference (faithful transcription of the PyTorch forward, f32 math)
# ---------------------------------------------------------------------------
def block_reference(x, params, *, num_heads=4, model_k=8):
    hi = jax.lax.Precision.HIGHEST
    xyz, xy_embed, nns, _, _ = x
    B, N, C = xy_embed.shape
    d = C // num_heads
    K = model_k
    knn_idx = nns[:, :, :K]
    gather = jax.vmap(lambda p, i: p[i])

    xn = _layernorm(xy_embed, params["g1"], params["b1"])
    qkv = jnp.matmul(xn, params["Wqkv"], precision=hi)
    q_feat, k_feat, v_feat = jnp.split(qkv, 3, axis=-1)
    xy_knn = gather(xyz, knn_idx)
    k_g = gather(k_feat, knn_idx)
    v_g = gather(v_feat, knn_idx)
    rel = xyz[:, :, None, :] - xy_knn
    pos = jnp.matmul(
        jnp.maximum(jnp.matmul(rel, params["dW1"], precision=hi) + params["db1"], 0.0),
        params["dW2"], precision=hi) + params["db2"]

    q = q_feat.reshape(B, N, num_heads, d).transpose(0, 2, 1, 3)           # [B,H,N,d]
    k = k_g.reshape(B, N, K, num_heads, d).transpose(0, 3, 1, 2, 4)        # [B,H,N,K,d]
    v = v_g.reshape(B, N, K, num_heads, d).transpose(0, 3, 1, 2, 4)
    pos_h = pos.transpose(0, 3, 1, 2).reshape(B, num_heads, d, N, K).transpose(0, 1, 3, 4, 2)

    logits = jnp.sum(q[:, :, :, None, :] * k, axis=-1) / jnp.sqrt(float(d))
    attn = jax.nn.softmax(logits, axis=-1)
    v = v + pos_h
    xa = jnp.sum(attn[..., None] * v, axis=-2).transpose(0, 2, 1, 3).reshape(B, N, C)
    xa = jnp.matmul(xa, params["pW"], precision=hi) + params["pb"]
    x1 = xy_embed + xa
    xn2 = _layernorm(x1, params["g2"], params["b2"])
    h = jax.nn.gelu(jnp.matmul(xn2, params["mW1"], precision=hi) + params["mb1"],
                    approximate=False)
    x2 = x1 + jnp.matmul(h, params["mW2"], precision=hi) + params["mb2"]
    return x2, attn


if __name__ == "__main__":
    B, N, C, H, K = 2, 16, 32, 4, 8
    Hd = int(C * 4.0)  # mlp_ratio = 4.0

    key = jax.random.PRNGKey(0)
    ks = jax.random.split(key, 16)
    xyz = jax.random.normal(ks[0], (B, N, 2), jnp.float32)
    xy_embed = jax.random.normal(ks[1], (B, N, C), jnp.float32)
    nns = jax.random.randint(ks[2], (B, N, K + 4), 0, N)   # forward uses nns[:, :, :K]

    s = 0.2
    params = dict(
        g1=jnp.ones((C,), jnp.float32), b1=jnp.zeros((C,), jnp.float32),
        Wqkv=s * jax.random.normal(ks[3], (C, 3 * C), jnp.float32),   # qkv_bias=False
        dW1=s * jax.random.normal(ks[4], (2, C), jnp.float32),
        db1=s * jax.random.normal(ks[5], (C,), jnp.float32),
        dW2=s * jax.random.normal(ks[6], (C, C), jnp.float32),
        db2=s * jax.random.normal(ks[7], (C,), jnp.float32),
        pW=s * jax.random.normal(ks[8], (C, C), jnp.float32),
        pb=s * jax.random.normal(ks[9], (C,), jnp.float32),
        g2=jnp.ones((C,), jnp.float32), b2=jnp.zeros((C,), jnp.float32),
        mW1=s * jax.random.normal(ks[10], (C, Hd), jnp.float32),
        mb1=s * jax.random.normal(ks[11], (Hd,), jnp.float32),
        mW2=s * jax.random.normal(ks[12], (Hd, C), jnp.float32),
        mb2=s * jax.random.normal(ks[13], (C,), jnp.float32),
    )

    inp = (xyz, xy_embed, nns, [], None)
    xyz_o, x_out, nns_o, xy_list, (attn, knn_idx) = block_forward(
        inp, params, num_heads=H, model_k=K)
    jax.block_until_ready(x_out)
    jax.block_until_ready(attn)

    x_ref, attn_ref = block_reference(inp, params, num_heads=H, model_k=K)
    assert x_out.shape == (B, N, C) and attn.shape == (B, H, N, K)
    # Kernel uses bf16 activations + bf16 MXU inputs (f32 accumulation); reference is
    # f32/HIGHEST, so tolerances reflect bf16 rounding through two matmul stacks.
    assert jnp.allclose(x_out, x_ref, rtol=5e-2, atol=8e-2), float(
        jnp.max(jnp.abs(x_out - x_ref)))
    assert jnp.allclose(attn, attn_ref, rtol=2.5e-2, atol=2.5e-2), float(
        jnp.max(jnp.abs(attn - attn_ref)))

    print("KERNEL_OK")
</pallas_src>

<mosaic_0001>
module attributes {stable_mosaic.version = 11 : i64} {
  func.func @ln_qkv_kernel(%arg0: i32, %arg1: i32, %arg2: memref<1x16x32xf32, #tpu.memory_space<vmem>>, %arg3: memref<1x32xf32, #tpu.memory_space<vmem>>, %arg4: memref<1x32xf32, #tpu.memory_space<vmem>>, %arg5: memref<32x96xf32, #tpu.memory_space<vmem>>, %arg6: memref<1x16x96xbf16, #tpu.memory_space<vmem>>) attributes {dimension_semantics = [#tpu.dimension_semantics<parallel>, #tpu.dimension_semantics<parallel>], iteration_bounds = array<i64: 2, 1>, scalar_prefetch = 0 : i64, scratch_operands = 0 : i64, tpu.core_type = #tpu.core_type<tc>, window_params = [{transform_indices = @transform_0, window_bounds = array<i64: 1, 16, 32>}, {pipeline_mode = #tpu.pipeline_mode<synchronous>, transform_indices = @transform_1, window_bounds = array<i64: 1, 32>}, {pipeline_mode = #tpu.pipeline_mode<synchronous>, transform_indices = @transform_2, window_bounds = array<i64: 1, 32>}, {pipeline_mode = #tpu.pipeline_mode<synchronous>, transform_indices = @transform_3, window_bounds = array<i64: 32, 96>}, {transform_indices = @transform_4, window_bounds = array<i64: 1, 16, 96>}]} {
    %c0 = arith.constant 0 : index
    %c0_0 = arith.constant 0 : index
    %c0_1 = arith.constant 0 : index
    %0 = vector.load %arg2[%c0, %c0_0, %c0_1] : memref<1x16x32xf32, #tpu.memory_space<vmem>>, vector<1x16x32xf32>
    %1 = vector.shape_cast %0 : vector<1x16x32xf32> to vector<16x32xf32>
    %c0_2 = arith.constant 0 : index
    %c0_3 = arith.constant 0 : index
    %2 = vector.load %arg3[%c0_2, %c0_3] : memref<1x32xf32, #tpu.memory_space<vmem>>, vector<1x32xf32>
    %c0_4 = arith.constant 0 : index
    %c0_5 = arith.constant 0 : index
    %3 = vector.load %arg4[%c0_4, %c0_5] : memref<1x32xf32, #tpu.memory_space<vmem>>, vector<1x32xf32>
    %cst = arith.constant dense<0.000000e+00> : vector<16xf32>
    %4 = vector.multi_reduction <add>, %1, %cst [1] : vector<16x32xf32> to vector<16xf32>
    %5 = vector.shape_cast %4 : vector<16xf32> to vector<16x1xf32>
    %cst_6 = arith.constant 3.200000e+01 : f32
    %6 = vector.broadcast %cst_6 : f32 to vector<16x1xf32>
    %7 = arith.divf %5, %6 : vector<16x1xf32>
    %8 = vector.broadcast %7 : vector<16x1xf32> to vector<16x32xf32>
    %9 = arith.subf %1, %8 : vector<16x32xf32>
    %10 = arith.mulf %9, %9 : vector<16x32xf32>
    %cst_7 = arith.constant dense<0.000000e+00> : vector<16xf32>
    %11 = vector.multi_reduction <add>, %10, %cst_7 [1] : vector<16x32xf32> to vector<16xf32>
    %12 = vector.shape_cast %11 : vector<16xf32> to vector<16x1xf32>
    %cst_8 = arith.constant 3.200000e+01 : f32
    %13 = vector.broadcast %cst_8 : f32 to vector<16x1xf32>
    %14 = arith.divf %12, %13 : vector<16x1xf32>
    %15 = vector.broadcast %7 : vector<16x1xf32> to vector<16x32xf32>
    %16 = arith.subf %1, %15 : vector<16x32xf32>
    %cst_9 = arith.constant 9.99999974E-6 : f32
    %17 = vector.broadcast %cst_9 : f32 to vector<16x1xf32>
    %18 = arith.addf %14, %17 : vector<16x1xf32>
    %19 = math.rsqrt %18 : vector<16x1xf32>
    %20 = vector.broadcast %19 : vector<16x1xf32> to vector<16x32xf32>
    %21 = arith.mulf %16, %20 : vector<16x32xf32>
    %22 = vector.broadcast %2 : vector<1x32xf32> to vector<16x32xf32>
    %23 = arith.mulf %21, %22 : vector<16x32xf32>
    %24 = vector.broadcast %3 : vector<1x32xf32> to vector<16x32xf32>
    %25 = arith.addf %23, %24 : vector<16x32xf32>
    %26 = arith.truncf %25 : vector<16x32xf32> to vector<16x32xbf16>
    %c0_10 = arith.constant 0 : index
    %c0_11 = arith.constant 0 : index
    %27 = vector.load %arg5[%c0_10, %c0_11] : memref<32x96xf32, #tpu.memory_space<vmem>>, vector<32x96xf32>
    %28 = arith.truncf %27 : vector<32x96xf32> to vector<32x96xbf16>
    %cst_12 = arith.constant dense<0.000000e+00> : vector<16x96xf32>
    %29 = tpu.matmul %26, %28, %cst_12 {dimension_numbers = #tpu.dot_dimension_numbers<[1], [0], [0], [1], [0, 0, 1, 1], [], []>} : vector<16x32xbf16>, vector<32x96xbf16>, vector<16x96xf32> -> vector<16x96xf32>
    %30 = arith.truncf %29 : vector<16x96xf32> to vector<16x96xbf16>
    %c0_13 = arith.constant 0 : index
    %c0_14 = arith.constant 0 : index
    %c0_15 = arith.constant 0 : index
    %31 = vector.load %arg6[%c0_13, %c0_14, %c0_15] : memref<1x16x96xbf16, #tpu.memory_space<vmem>>, vector<1x16x96xbf16>
    %32 = vector.shape_cast %31 : vector<1x16x96xbf16> to vector<16x96xbf16>
    %33 = vector.shape_cast %30 : vector<16x96xbf16> to vector<1x16x96xbf16>
    tpu.vector_store %arg6[%c0_13, %c0_14, %c0_15], %33 {strides = array<i32>} : memref<1x16x96xbf16, #tpu.memory_space<vmem>>, vector<1x16x96xbf16>,
    return
  }
  func.func @transform_0(%arg0: i32, %arg1: i32) -> (i32, i32, i32) {
    %c0_i32 = arith.constant 0 : i32
    %c0_i32_0 = arith.constant 0 : i32
    return %arg0, %arg1, %c0_i32 : i32, i32, i32
  }
  func.func @transform_1(%arg0: i32, %arg1: i32) -> (i32, i32) {
    %c0_i32 = arith.constant 0 : i32
    %c0_i32_0 = arith.constant 0 : i32
    %c0_i32_1 = arith.constant 0 : i32
    return %c0_i32, %c0_i32_0 : i32, i32
  }
  func.func @transform_2(%arg0: i32, %arg1: i32) -> (i32, i32) {
    %c0_i32 = arith.constant 0 : i32
    %c0_i32_0 = arith.constant 0 : i32
    %c0_i32_1 = arith.constant 0 : i32
    return %c0_i32, %c0_i32_0 : i32, i32
  }
  func.func @transform_3(%arg0: i32, %arg1: i32) -> (i32, i32) {
    %c0_i32 = arith.constant 0 : i32
    %c0_i32_0 = arith.constant 0 : i32
    %c0_i32_1 = arith.constant 0 : i32
    return %c0_i32, %c0_i32_0 : i32, i32
  }
  func.func @transform_4(%arg0: i32, %arg1: i32) -> (i32, i32, i32) {
    %c0_i32 = arith.constant 0 : i32
    %c0_i32_0 = arith.constant 0 : i32
    return %arg0, %arg1, %c0_i32 : i32, i32, i32
  }
}

</mosaic_0001>

<bundles_post_ra>
// kernel: tpu_custom_call.1
= control target key start
LH: loop header
LB: loop body
LE: loop exit
PB: predicated region body
PF: predicated region fallthrough
CT: control target
= control target key end

     0   :  { %s968_s0 = inlined_call_operand.hbm [shape: f32[2,16,32], index: 0, kind: input, shape index: {}]   ;;  %s969_s1 = inlined_call_operand.vmem [shape: f32[1,32], index: 1, kind: input, shape index: {}]   ;;  %s970_s2 = inlined_call_operand.vmem [shape: f32[1,32], index: 2, kind: input, shape index: {}]   ;;  %s971_s3 = inlined_call_operand.hbm [shape: f32[32,96], index: 3, kind: input, shape index: {}]   ;;  %s972_s4 = inlined_call_operand.hbm [shape: bf16[2,16,96], index: 4, kind: output, shape index: {}]  }
   0x1   :  { %976 = sst [smem:[#allocation11_spill]] %s971_s3 }
   0x2   :  { %9 = vsyncpa [#allocation3], 0 }
   0x3   :  { %11 = vsyncpa [#allocation3 + $0x1], 0 }
   0x4   :  { %12 = vsyncpa [#allocation6], 0 }
   0x5   :  { %13 = vsyncpa [#allocation4], 0 }
   0x6   :  { %15 = vsyncpa [#allocation4 + $0x1], 0  ;;  %s769_s15 = smov 0   ;;  %s771_s16 = smov 0  }
   0x7   :  { %s773_s17 = smov 0   ;;  %s775_s18 = smov 0  }
   0x8   :  { %s777_s19 = smov 0   ;;  %s779_s20 = smov 0  }
   0x9 LB: > { %s475_s21 = sadd.s32 4294967295, %s733_s20   ;;  %s476_s22 = sadd.s32 4294967294, %s733_s20   ;;  %s733_s20 = sphi %s779_s20, %s21_s20   ;;  %s729_s19 = sphi %s777_s19, %s996_s19   ;;  %s725_s18 = sphi %s775_s18, %s995_s18   ;;  %s721_s17 = sphi %s773_s17, %s994_s17   ;;  %s717_s16 = sphi %s771_s16, %s993_s16   ;;  %s713_s15 = sphi %s769_s15, %s992_s15  }
   0xa   : > { %p55_p0 = scmp.ne.s32.totalorder %s717_s16, %s713_s15  ;;  %p803_p1 = scmp.eq.s32.totalorder %s475_s21, 0 }
   0xb   : > { %p807_p2 = scmp.eq.s32.totalorder %s475_s21, 1  ;;  %p150_p3 = scmp.eq.s32.totalorder %s476_s22, 1 }
   0xc   : > { %p813_p4 = por %p803_p1, %p55_p0  ;;  %p477_p5 = scmp.ge.s32.totalorder %s733_s20, 1 }
   0xd   : > { %p818_p6 = por %p150_p3, %p55_p0  ;;  %p157_p7 = scmp.lt.s32.totalorder %s733_s20, 3 }
   0xe   : > { %s979_s25 = scalar_select %p813_p4, 1, 0 }
   0xf   : > { %s980_s26 = scalar_select %p818_p6, 1, 0 }
  0x10   : > { %p823_p8 = pnand %p477_p5, %p157_p7  ;;  %s735_s28 = smov [#allocation5]  }
  0x11   : > { %s175_s29 = sshll.u32 %s735_s28, 4  ;;  %s33_s5 = sadd.s32 1, %s729_s19  ;;  %s176_s29 = int_to_ptr.vmem [resolvable:$true] %s175_s29 }
  0x12   : > { %p520_p9 = pneg %p823_p8  ;;  %s606_s6 = scalar_lea.vmem %s176_s29, 512 }
  0x13   : > { %p607_p13 = scmp.ne.s32.totalorder %s176_s29, %s606_s6  ;;  %p614_p5 = scmp.lt.s32.totalorder %s176_s29, %s176_s29 }
  0x14   : > { %p832_p11 = pnand %p520_p9, %p803_p1  ;;  %p615_p7 = scmp.lt.s32.totalorder %s606_s6, %s606_s6 }
  0x16   : > { %p597_p12 = pneg %p832_p11  ;;  %p616_p6 = por %p615_p7, %p614_p5 }
  0x18   : > { %p609_p0 = pnand %p607_p13, %p597_p12 }
  0x1a   : > { %p610_p3 = pneg %p609_p0 }
  0x1c   : > { %p617_p4 = pnand %p616_p6, %p610_p3 }
  0x1e   : > { %620 = shalt.err (!%p617_p4)
}
  0x1f   : > { %s974_s7 = smov 128   ;;  %s975_s8 = smov 8  }
  0x20   : > { %s983_s3 = sld [smem:[#allocation11_spill]]  ;;  %p35_p4 = scmp.ge.s32.totalorder %s33_s5, 2 }
  0x21   : > { %s42_s11 = sadd.s32 1, %s721_s17  ;;  %p49_p6 = scmp.ne.s32.totalorder %s721_s17, %s717_s16 }
  0x22   : > { %p50_p9 = scmp.eq.s32.totalorder %s733_s20, 0  ;;  %s998_s5 = smov (%p35_p4, %s33_s5), 0 }
  0x23   : > { %p859_p13 = por %p807_p2, %p49_p6  ;;  %s37_s14 = ssub.s32 %s729_s19, %s998_s5 }
  0x24   : > { %p853_p12 = por %p50_p9, %p49_p6  ;;  %p533_p0 = scmp.lt.s32.totalorder %s733_s20, 2 }
  0x25   : > { %s189_s21 = sand.u32 1, %s721_s17  }
  0x26   : > { %523 = dma.hbm_to_vmem [thread:$0]  (!%p832_p11), %s983_s3, 512, %s176_s29, [#allocation6], %s974_s7, %s974_s7, %s975_s8  }
  0x27   : > { %p40_p11 = scmp.eq.s32.totalorder %s37_s14, 0  ;;  %s480_s22 = sshll.u32 %s189_s21, 4 }
  0x28   : > { %s497_s29 = sshll.u32 %s729_s19, 8  ;;  %s193_s10 = scalar_lea.vmem [#allocation2], %s480_s22 }
  0x29   : > { %s868_s28 = scalar_select %p40_p11, %s721_s17, %s42_s11  }
  0x2a   : > { %s201_s9 = scalar_lea.hbm %s968_s0, %s497_s29  ;;  %s202_s7 = sshll.u32 %s193_s10, 4  ;;  %s203_s7 = int_to_ptr.vmem [resolvable:$true] %s202_s7 }
  0x2b   : > { %p876_p2 = pnand %p533_p0, %p853_p12  ;;  %s190_s8 = scalar_lea.sflag [#allocation3], %s189_s21 }
  0x2c   : > { %s634_s14 = scalar_lea.vmem %s203_s7, 256  ;;  %s738_s11 = smov [#allocation2]  }
  0x2d   : > { %p623_p3 = pneg %p876_p2  ;;  %p635_p5 = scmp.ne.s32.totalorder %s203_s7, %s634_s14 }
  0x2e   : > { %s639_s3 = sshll.u32 %s738_s11, 4  ;;  %s640_s3 = int_to_ptr.vmem [resolvable:$false] %s639_s3 }
  0x2f   : > { %p637_p7 = pnand %p635_p5, %p623_p3  ;;  %s641_s29 = scalar_lea.vmem %s640_s3, 512 }
  0x30   : > { %p642_p6 = scmp.lt.s32.totalorder %s203_s7, %s640_s3  ;;  %p643_p9 = scmp.lt.s32.totalorder %s641_s29, %s634_s14 }
  0x31   : > { %p638_p4 = pneg %p637_p7 }
  0x32   : > { %p644_p11 = por %p643_p9, %p642_p6 }
  0x34   : > { %p645_p10 = pnand %p644_p11, %p638_p4 }
  0x36   : > { %648 = shalt.err (!%p645_p10)
}
  0x37   : > { %s987_s12 = smov 8   ;;  %s988_s22 = smov 128  }
  0x38   : > { %527 = dma.hbm_to_vmem [thread:$0]  (!%p876_p2), %s201_s9, 256, %s203_s7, %s190_s8, %s988_s22, %s988_s22, %s987_s12  }
  0x39   : > { %214 = sbr.rel (%p823_p8) target bundleno = 593 (0x251), region = 36  ;;  %s890_s21 = sand.u32 (!%p823_p8), 1, %s717_s16  }
  0x3a   : > { %s484_s3 = sshll.u32 (!%p823_p8), %s890_s21, 4  ;;  %s217_s30 = scalar_lea.sflag (!%p823_p8), [#allocation3], %s890_s21 }
  0x3b   : > { %s220_s6 = scalar_lea.vmem (!%p823_p8), [#allocation2], %s484_s3  ;;  %p989_p12 = scmp.ne.s32.totalorder (!%p823_p8), %s979_s25, 0 }
  0x3e   : > { %700 = dma.done.wait (%p989_p12), %s217_s30, 256  }
  0x3f   : > { %702 = vsyncadd (%p989_p12), %s217_s30, 4294967040 }
  0x40   : > { %704 = dma.done.wait (%p803_p1), [#allocation6], 512  }
  0x41   : > { %706 = vsyncadd (%p803_p1), [#allocation6], 4294966784  ;;  %vm256_vm0 = vcmask 261120   ;;  %v252_v0 = vld [vmem:[%s220_s6] sm:$0xff]  ;;  %v253_v1 = vld [vmem:[%s220_s6 + $0x8] sm:$0xff]  ;;  %v739_v17 = vmov 0.0  }
  0x42   : > { %v257_v2 = vsel %vm256_vm0, %v252_v0, 0.0  ;;  %v260_v3 = vsel %vm256_vm0, %v253_v1, 0.0  ;;  %v303_v14 = vld [vmem:[#allocation5 + $0x10] sm:$0xff]  ;;  %v304_v15 = vld [vmem:[#allocation5 + $0x18] sm:$0xff]  ;;  %v301_v16 = vld [vmem:[#allocation5] sm:$0xff]  ;;  %504 = vmatprep.subr.bf16.mxu0 %v739_v17  ;;  %vm740_vm1 = vmmov 0  }
  0x43   : > { %258 = vadd.xlane.f32.xlu0 %v257_v2  ;;  %v306_v18 = vpack.c.bf16 %v304_v15, %v303_v14  ;;  %v302_v19 = vld [vmem:[#allocation5 + $0x8] sm:$0xff]  ;;  %508 = vmatprep.mubr.msk.bf16.mxu0 %vm740_vm1, %v739_v17  ;;  %v487_v29 = vld [vmem:[%s969_s1] ss:$0 sm:$0xff]  ;;  %s486_s8 = sshll.u32 %s890_s21, 3  ;;  %vm359_vm2 = vcmask 781312   ;;  %s500_s24 = sshll.u32 %s725_s18, 7 }
  0x44   : > { %v305_v20 = vpack.c.bf16 %v302_v19, %v301_v16  ;;  %v488_v33 = vld [vmem:[%s970_s2] ss:$0 sm:$0xff]  ;;  %s248_s9 = scalar_lea.vmem [#allocation7], %s486_s8  ;;  %s920_s29 = scalar_lea.hbm %s972_s4, %s500_s24 }
  0x45   : > { %505 = vmatpush3.bf16.msra.mxu0 %v306_v18  ;;  %s378_s10 = sshll.u32 %s248_s9, 4  ;;  %s363_s12 = scalar_lea.sflag [#allocation4], %s890_s21  ;;  %s915_s10 = int_to_ptr.vmem [resolvable:$true] %s378_s10 }
  0x46   : > { %506 = vmatprep.subr.bf16.mxu0 %v739_v17  ;;  %s649_s22 = scalar_lea.vmem %s915_s10, 128  ;;  %s741_s18 = smov [#allocation7]  }
  0x47   : > { %261 = vadd.xlane.f32.xlu0 %v260_v3  ;;  %p650_p1 = scmp.ne.s32.totalorder %s915_s10, %s649_s22  ;;  %s653_s3 = sshll.u32 %s741_s18, 4  ;;  %s654_s3 = int_to_ptr.vmem [resolvable:$false] %s653_s3 }
  0x48   : > { %s655_s30 = scalar_lea.vmem %s654_s3, 256  ;;  %p656_p0 = scmp.lt.s32.totalorder %s915_s10, %s654_s3 }
  0x49   : > { %507 = vmatpush3.bf16.msra.mxu0 %v305_v20  ;;  %p651_p8 = pnand %p650_p1, %p859_p13  ;;  %p657_p2 = scmp.lt.s32.totalorder %s655_s30, %s649_s22 }
  0x4b   : > { %p652_p10 = pneg %p651_p8  ;;  %p658_p3 = por %p657_p2, %p656_p0 }
  0x4d   : > { %p659_p5 = pnand %p658_p3, %p652_p10 }
  0xcc   : > { %v259_v4 = vpop.xlane.xlu0 %258 }
  0xcd   : > { %v264_v5 = vmul.f32 0.03125, %v259_v4 }
  0xcf   : > { %v266_v6 = vsub.f32 %v252_v0, %v264_v5 }
  0xd0   : > { %v262_v7 = vpop.xlane.xlu0 %261 }
  0xd1   : > { %v265_v8 = vmul.f32 0.03125, %v262_v7  ;;  %v268_v9 = vmul.f32 %v266_v6, %v266_v6 }
  0xd3   : > { %v267_v10 = vsub.f32 %v253_v1, %v265_v8  ;;  %v270_v11 = vsel %vm256_vm0, %v268_v9, 0.0 }
  0xd4   : > { %271 = vadd.xlane.f32.xlu1 %v270_v11 }
  0xd5   : > { %v269_v12 = vmul.f32 %v267_v10, %v267_v10 }
  0xd7   : > { %v273_v13 = vsel %vm256_vm0, %v269_v12, 0.0 }
  0xd8   : > { %274 = vadd.xlane.f32.xlu1 %v273_v13 }
 0x15d   : > { %v272_v21 = vpop.xlane.xlu1 %271 }
 0x15e   : > { %v276_v22 = vmul.f32 0.03125, %v272_v21 }
 0x160   : > { %v278_v23 = vadd.f32 1e-05, %v276_v22 }
 0x161   : > { %v275_v24 = vpop.xlane.xlu1 %274 }
 0x162   : > { %591 = vrsqrt.f32 %v278_v23  ;;  %v277_v25 = vmul.f32 0.03125, %v275_v24 }
 0x164   : > { %v279_v26 = vadd.f32 1e-05, %v277_v25 }
 0x166   : > { %593 = vrsqrt.f32 %v279_v26 }
 0x16f   : > { %v592_v27 = vpop.eup %591 }
 0x170   : > { %v282_v28 = vmul.f32 %v592_v27, %v266_v6 }
 0x172   : > { %v290_v32 = vmul.f32 %v487_v29, %v282_v28 }
 0x173   : > { %v594_v30 = vpop.eup %593 }
 0x174   : > { %v283_v31 = vmul.f32 %v594_v30, %v267_v10  ;;  %v298_v35 = vadd.f32 %v488_v33, %v290_v32 }
 0x176   : > { %v291_v34 = vmul.f32 %v487_v29, %v283_v31 }
 0x178   : > { %v299_v36 = vadd.f32 %v488_v33, %v291_v34 }
 0x17a   : > { %v300_v37 = vpack.c.bf16 %v299_v36, %v298_v35 }
 0x17c   : > { %509 = vmatmul.mubr.msk.bf16.vlgmr.msra.gmra.mxu0 %vm256_vm0, %v300_v37 }
 0x23c   : > { %v344_v38 = vpop.f32.mrf.mxu0 }
 0x23d   : > { %v498_v39 = vpack.c.bf16 %v344_v38, %v344_v38 }
 0x23e   : > { %v510_v40 = vpop.f32.mrf.mxu0 }
 0x23f   : > { %360 = vst.msk [vmem:[%s248_s9] sm:$0xf] %vm359_vm2, %v498_v39 }
 0x240   : > { %v347_v41 = vpop.f32.mrf.mxu0 }
 0x241   : > { %v499_v42 = vpack.c.bf16 %v347_v41, %v347_v41 }
 0x242   : > { %v511_v43 = vpop.f32.mrf.mxu0 }
 0x243   : > { %361 = vst.msk [vmem:[%s248_s9 + $0x4] sm:$0xf] %vm359_vm2, %v499_v42 }
 0x244   : > { %662 = shalt.err (!%p659_p5)
}
 0x245   : > { %s663_s6 = scalar_lea.hbm %s920_s29, 128  ;;  %s667_s27 = scalar_lea.hbm %s972_s4, 256 }
 0x246   : > { %p664_p7 = scmp.ne.s32.totalorder %s920_s29, %s663_s6  ;;  %p668_p9 = scmp.lt.s32.totalorder %s920_s29, %s972_s4 }
 0x247   : > { %p669_p11 = scmp.lt.s32.totalorder %s667_s27, %s663_s6 }
 0x248   : > { %p665_p4 = pnand %p664_p7, %p859_p13 }
 0x249   : > { %p670_p12 = por %p669_p11, %p668_p9 }
 0x24a   : > { %p666_p6 = pneg %p665_p4 }
 0x24c   : > { %p671_p1 = pnand %p670_p12, %p666_p6 }
 0x24e   : > { %674 = shalt.err (!%p671_p1)
}
 0x24f   : > { %s742_s9 = smov 64   ;;  %s743_s24 = smov 4  }
 0x250   : > { %518 = dma.vmem_to_hbm [thread:$0]  (%p859_p13), %s915_s10, 128, %s920_s29, %s363_s12, %s742_s9, %s742_s9, %s743_s24  }
 0x251 PF: > { %s393_s14 = sand.u32 1, %s713_s15   ;;  %p990_p8 = scmp.ne.s32.totalorder %s980_s26, 0 }
 0x252   : > { %p991_p10 = scmp.ge.s32.totalorder %s733_s20, 2  ;;  %s394_s11 = scalar_lea.sflag [#allocation4], %s393_s14 }
 0x254   : > { %p529_p0 = pnand %p991_p10, %p990_p8 }
 0x256   : > { %p530_p2 = pneg %p529_p0 }
 0x258   : > { %708 = dma.done.wait (%p530_p2), %s394_s11, 128  }
 0x259   : > { %710 = vsyncadd (%p530_p2), %s394_s11, 4294967168  ;;  %s21_s20 = sadd.s32 1, %s733_s20   ;;  %s992_s15 = smov %s717_s16 }
 0x25a   : > { %p18_p3 = scmp.ge.s32.totalorder %s21_s20, 4   ;;  %s993_s16 = smov %s721_s17 }
 0x25b   : > { %s994_s17 = smov %s868_s28  ;;  %s995_s18 = smov %s729_s19 }
 0x25c   : > { %s996_s19 = smov %s998_s5  ;;  %20 = sbr.rel (!%p18_p3) target bundleno = 9 (0x9), region = 85 }
 0x261   :  { %399 = vsyncpa [#allocation3], 1 }
 0x262   :  { %401 = vsyncpa [#allocation3 + $0x1], 1 }
 0x263   :  { %402 = vsyncpa [#allocation6], 1 }
 0x264   :  { %403 = vsyncpa [#allocation4], 1 }
 0x265   :  { %405 = vsyncpa [#allocation4 + $0x1], 1 }

</bundles_post_ra>
